<compile_context>
chip_gen: v7x
topology: tpu7x:2x2x1
jax: 0.10.0
libtpu: 0.0.40
codegen_flags: <defaults>
</compile_context>

<pallas_src>
import functools
import math

import jax
import jax.numpy as jnp
from jax.experimental import pallas as pl
from jax.experimental.pallas import tpu as pltpu


def _round_up(x, m):
    return (x + m - 1) // m * m


def _data_embedding_kernel(x_ref, w_ref, pe_ref, o_ref, *, matmul_dtype):
    # x_ref : (TB, Lp, Cin)   TB full sequences, Lp % 8 == 0
    # w_ref : (3, Cin, Dp)    conv weight, tap-major (resident across grid)
    # pe_ref: (Lp, Dp)        positional encoding (resident across grid)
    # o_ref : (TB, Lp, Dp)
    tb, lp, cin = x_ref.shape
    dp = w_ref.shape[-1]

    x = x_ref[...]
    # Circular shifts along time; each leading-dim sequence slab rolls independently.
    xm1 = pltpu.roll(x, 1, 1)         # x[t-1]
    xp1 = pltpu.roll(x, lp - 1, 1)    # x[t+1]

    # Free views (Lp % 8 == 0, lane dim unchanged).
    x0 = xm1.reshape(tb * lp, cin)
    x1 = x.reshape(tb * lp, cin)
    x2 = xp1.reshape(tb * lp, cin)
    if matmul_dtype is not None:      # w is pre-cast in the wrapper
        x0 = x0.astype(matmul_dtype)
        x1 = x1.astype(matmul_dtype)
        x2 = x2.astype(matmul_dtype)

    # Tap-folded on the input side: accumulate directly into the final
    # lane-dense (TB*Lp, Dp) tile, f32 accumulation on the MXU.
    y = jnp.dot(x0, w_ref[0], preferred_element_type=jnp.float32)
    y = y + jnp.dot(x1, w_ref[1], preferred_element_type=jnp.float32)
    y = y + jnp.dot(x2, w_ref[2], preferred_element_type=jnp.float32)

    out = y.reshape(tb, lp, dp) + pe_ref[...][None]      # free view + PE add (f32)
    o_ref[...] = out.astype(o_ref.dtype)                 # cast only at the store


def _vmem_plan():
    """Generation-aware (vmem_limit_bytes, block budget) in bytes."""
    cap = None
    try:
        cap = getattr(pltpu.get_tpu_info(), "vmem_capacity_bytes", None)
    except Exception:
        cap = None
    if cap is None:
        cap = 64 * 1024 * 1024                     # conservative: v7x per-TC VMEM
    if cap >= 96 * 1024 * 1024:                    # v5e / v6e class: 128 MiB physical
        limit = 96 * 1024 * 1024
    else:                                          # v7x class: 64 MiB per TC
        limit = 44 * 1024 * 1024
    return limit, int(limit * 0.6)


def _choose_batch_tile(B, Lp, Cin, Dp, *, in_itemsize, out_itemsize, w_itemsize,
                       vmem_budget, min_grid_steps):
    """Largest batch tile fitting the VMEM budget while keeping ~min_grid_steps steps."""
    # Resident (double-buffered by the pipeline) weight + PE blocks.
    fixed = 2 * (3 * Cin * Dp * w_itemsize + Lp * Dp * 4)
    # Per-sequence cost: double-buffered x/out blocks, rolled temps, two live
    # f32 accumulators from the chained dots.
    per_seq = (2 * Lp * Cin * in_itemsize
               + 2 * Lp * Dp * out_itemsize
               + 4 * Lp * Cin * 4
               + 2 * Lp * Dp * 4)
    avail = max(vmem_budget - fixed, per_seq)
    tb_vmem = max(1, avail // per_seq)
    # Enough steps to feed both v7x TensorCores (>=3-4 each) and reach pipeline
    # steady state on single-TC parts, without degenerate tiles for small B.
    tb_steps = max(1, B // max(1, min(B, min_grid_steps)))
    return int(max(1, min(B, tb_vmem, tb_steps)))


def data_embedding(x, w, pe, *, matmul_dtype=None, out_dtype=None, min_grid_steps=8):
    """DataEmbedding forward.

    x : (B, L, Cin) f32    (batch, seq_len, input_size) -- as PyTorch forward sees it
    w : (3, Cin, D) f32    conv1d weight in (tap, in_ch, out_ch) layout
    pe: (>=L, D)   f32     sinusoidal positional-encoding table
    matmul_dtype : optional MXU input dtype (e.g. jnp.bfloat16); accumulation stays f32
    out_dtype    : optional stored dtype (bf16 recommended on v6e/v7x -- the kernel is
                   HBM-write bound so halving the output write ~halves wall clock)
    returns (B, L, D)
    """
    B, L, Cin = x.shape
    taps, wc, D = w.shape
    assert taps == 3 and wc == Cin
    out_dtype = out_dtype if out_dtype is not None else x.dtype
    pe = pe[:L]

    # Lane-dense output: pad d_model to a multiple of 128 (zero weight/PE columns).
    Dp = _round_up(D, 128)
    if Dp != D:
        w = jnp.pad(w, ((0, 0), (0, 0), (0, Dp - D)))
        pe = jnp.pad(pe, ((0, 0), (0, Dp - D)))
    if matmul_dtype is not None:
        w = w.astype(matmul_dtype)       # cast once here, not per grid step

    # Sublane-align the time axis so in-kernel reshapes are free views.
    # The pad rows adjacent to the wrap point hold the circular-boundary values,
    # so the in-kernel rolls (over the padded length) remain exact for rows < L.
    Lp = L
    if L % 8:
        Lp = _round_up(L, 8)
        if Lp - L < 2:                   # need two distinct boundary rows
            Lp += 8
        pad = jnp.zeros((B, Lp - L, Cin), x.dtype)
        pad = pad.at[:, 0, :].set(x[:, 0, :])       # row L    = x[:, 0]   (x[t+1] at t=L-1)
        pad = pad.at[:, -1, :].set(x[:, L - 1, :])  # row Lp-1 = x[:, L-1] (x[t-1] at t=0)
        x = jnp.concatenate([x, pad], axis=1)
        pe = jnp.pad(pe, ((0, Lp - L), (0, 0)))

    vmem_limit, vmem_budget = _vmem_plan()
    TB = _choose_batch_tile(
        B, Lp, Cin, Dp,
        in_itemsize=x.dtype.itemsize,
        out_itemsize=jnp.dtype(out_dtype).itemsize,
        w_itemsize=w.dtype.itemsize,
        vmem_budget=vmem_budget,
        min_grid_steps=min_grid_steps)
    grid = (pl.cdiv(B, TB),)             # ragged last block allowed

    kernel = functools.partial(_data_embedding_kernel, matmul_dtype=matmul_dtype)

    flops = 2 * B * Lp * 3 * Cin * Dp
    bytes_accessed = (x.size * x.dtype.itemsize
                      + w.size * w.dtype.itemsize
                      + pe.size * pe.dtype.itemsize
                      + B * Lp * Dp * jnp.dtype(out_dtype).itemsize)

    out = pl.pallas_call(
        kernel,
        out_shape=jax.ShapeDtypeStruct((B, Lp, Dp), out_dtype),
        grid=grid,
        in_specs=[
            pl.BlockSpec((TB, Lp, Cin), lambda b: (b, 0, 0)),
            pl.BlockSpec((3, Cin, Dp), lambda b: (0, 0, 0)),   # resident weight
            pl.BlockSpec((Lp, Dp), lambda b: (0, 0)),          # resident PE
        ],
        out_specs=pl.BlockSpec((TB, Lp, Dp), lambda b: (b, 0, 0)),
        compiler_params=pltpu.CompilerParams(
            dimension_semantics=("parallel",),
            vmem_limit_bytes=vmem_limit,
        ),
        cost_estimate=pl.CostEstimate(
            flops=flops, transcendentals=0, bytes_accessed=bytes_accessed),
    )(x, w, pe)

    if Lp != L or Dp != D:
        # With the usual deployment shapes (d_model % 128 == 0, L % 8 == 0) this
        # trim disappears entirely.
        # TODO(synk): for padded shapes, let the downstream consumer read the
        # padded (B, Lp, Dp) tensor directly instead of materializing this slice.
        out = out[:, :L, :D]
    return out


def make_positional_encoding(L, d_model):
    position = jnp.arange(L, dtype=jnp.float32)[:, None]
    div_term = jnp.exp(
        jnp.arange(0, d_model, 2, dtype=jnp.float32) * (-(math.log(10000.0) / d_model)))
    pe = jnp.zeros((L, d_model), jnp.float32)
    pe = pe.at[:, 0::2].set(jnp.sin(position * div_term))
    pe = pe.at[:, 1::2].set(jnp.cos(position * div_term))
    return pe


def make_token_conv_weight(key, input_size, d_model):
    # torch Conv1d weight shape: (d_model, input_size, 3); kaiming_normal_
    # fan_in mode, leaky_relu -> std ~= sqrt(2) / sqrt(input_size * 3).
    fan_in = input_size * 3
    std = math.sqrt(2.0) / math.sqrt(fan_in)
    w_torch = jax.random.normal(key, (d_model, input_size, 3), jnp.float32) * std
    # reorder to (tap, in_ch, out_ch) for the kernel's matmul form.
    return jnp.transpose(w_torch, (2, 1, 0))  # (3, input_size, d_model)


if __name__ == "__main__":
    def _reference(x, w, pe):
        # circular conv1d (k=3, pad=1, no bias) + PE; Dropout(p=0.0) == identity.
        return (jnp.einsum("blc,cd->bld", jnp.roll(x, 1, axis=1), w[0])
                + jnp.einsum("blc,cd->bld", x, w[1])
                + jnp.einsum("blc,cd->bld", jnp.roll(x, -1, axis=1), w[2])
                + pe[None])

    key = jax.random.PRNGKey(0)

    # Primary demo shapes.
    B, L, input_size, d_model = 2, 16, 8, 32
    kx, kw, key = jax.random.split(key, 3)
    x = jax.random.normal(kx, (B, L, input_size), jnp.float32)
    w = make_token_conv_weight(kw, input_size, d_model)
    pe = make_positional_encoding(L, d_model)

    out = jax.block_until_ready(data_embedding(x, w, pe))
    assert out.shape == (B, L, d_model)
    assert jnp.allclose(out, _reference(x, w, pe), atol=1e-4, rtol=1e-4)

    # Second case exercising the L % 8 != 0 circular-boundary pad path.
    B2, L2, cin2, d2 = 3, 10, 5, 48
    kx2, kw2, key = jax.random.split(key, 3)
    x2 = jax.random.normal(kx2, (B2, L2, cin2), jnp.float32)
    w2 = make_token_conv_weight(kw2, cin2, d2)
    pe2 = make_positional_encoding(L2, d2)

    out2 = jax.block_until_ready(data_embedding(x2, w2, pe2))
    assert out2.shape == (B2, L2, d2)
    assert jnp.allclose(out2, _reference(x2, w2, pe2), atol=1e-4, rtol=1e-4)

    print("KERNEL_OK")
</pallas_src>

<mosaic_0001>
module attributes {stable_mosaic.version = 11 : i64} {
  func.func @_data_embedding_kernel(%arg0: i32, %arg1: memref<1x16x8xf32, #tpu.memory_space<vmem>>, %arg2: memref<3x8x128xf32, #tpu.memory_space<vmem>>, %arg3: memref<16x128xf32, #tpu.memory_space<vmem>>, %arg4: memref<1x16x128xf32, #tpu.memory_space<vmem>>) attributes {dimension_semantics = [#tpu.dimension_semantics<parallel>], iteration_bounds = array<i64: 2>, scalar_prefetch = 0 : i64, scratch_operands = 0 : i64, tpu.core_type = #tpu.core_type<tc>, window_params = [{transform_indices = @transform_0, window_bounds = array<i64: 1, 16, 8>}, {pipeline_mode = #tpu.pipeline_mode<synchronous>, transform_indices = @transform_1, window_bounds = array<i64: 3, 8, 128>}, {pipeline_mode = #tpu.pipeline_mode<synchronous>, transform_indices = @transform_2, window_bounds = array<i64: 16, 128>}, {transform_indices = @transform_3, window_bounds = array<i64: 1, 16, 128>}]} {
    %c0 = arith.constant 0 : index
    %c0_0 = arith.constant 0 : index
    %c0_1 = arith.constant 0 : index
    %0 = vector.load %arg1[%c0, %c0_0, %c0_1] : memref<1x16x8xf32, #tpu.memory_space<vmem>>, vector<1x16x8xf32>
    %c1_i32 = arith.constant 1 : i32
    %1 = tpu.dynamic_rotate %0 by %c1_i32 dim 1 : vector<1x16x8xf32>, i32 -> vector<1x16x8xf32>
    %c15_i32 = arith.constant 15 : i32
    %2 = tpu.dynamic_rotate %0 by %c15_i32 dim 1 : vector<1x16x8xf32>, i32 -> vector<1x16x8xf32>
    %3 = vector.shape_cast %1 : vector<1x16x8xf32> to vector<16x8xf32>
    %4 = vector.shape_cast %0 : vector<1x16x8xf32> to vector<16x8xf32>
    %5 = vector.shape_cast %2 : vector<1x16x8xf32> to vector<16x8xf32>
    %c0_2 = arith.constant 0 : index
    %c0_3 = arith.constant 0 : index
    %c0_4 = arith.constant 0 : index
    %6 = vector.load %arg2[%c0_2, %c0_3, %c0_4] : memref<3x8x128xf32, #tpu.memory_space<vmem>>, vector<1x8x128xf32>
    %7 = vector.shape_cast %6 : vector<1x8x128xf32> to vector<8x128xf32>
    %cst = arith.constant dense<0.000000e+00> : vector<16x128xf32>
    %8 = tpu.matmul %3, %7, %cst {dimension_numbers = #tpu.dot_dimension_numbers<[1], [0], [0], [1], [0, 0, 1, 1], [], []>} : vector<16x8xf32>, vector<8x128xf32>, vector<16x128xf32> -> vector<16x128xf32>
    %c1 = arith.constant 1 : index
    %c0_5 = arith.constant 0 : index
    %c0_6 = arith.constant 0 : index
    %9 = vector.load %arg2[%c1, %c0_5, %c0_6] : memref<3x8x128xf32, #tpu.memory_space<vmem>>, vector<1x8x128xf32>
    %10 = vector.shape_cast %9 : vector<1x8x128xf32> to vector<8x128xf32>
    %cst_7 = arith.constant dense<0.000000e+00> : vector<16x128xf32>
    %11 = tpu.matmul %4, %10, %cst_7 {dimension_numbers = #tpu.dot_dimension_numbers<[1], [0], [0], [1], [0, 0, 1, 1], [], []>} : vector<16x8xf32>, vector<8x128xf32>, vector<16x128xf32> -> vector<16x128xf32>
    %12 = arith.addf %8, %11 : vector<16x128xf32>
    %c2 = arith.constant 2 : index
    %c0_8 = arith.constant 0 : index
    %c0_9 = arith.constant 0 : index
    %13 = vector.load %arg2[%c2, %c0_8, %c0_9] : memref<3x8x128xf32, #tpu.memory_space<vmem>>, vector<1x8x128xf32>
    %14 = vector.shape_cast %13 : vector<1x8x128xf32> to vector<8x128xf32>
    %cst_10 = arith.constant dense<0.000000e+00> : vector<16x128xf32>
    %15 = tpu.matmul %5, %14, %cst_10 {dimension_numbers = #tpu.dot_dimension_numbers<[1], [0], [0], [1], [0, 0, 1, 1], [], []>} : vector<16x8xf32>, vector<8x128xf32>, vector<16x128xf32> -> vector<16x128xf32>
    %16 = arith.addf %12, %15 : vector<16x128xf32>
    %17 = vector.shape_cast %16 : vector<16x128xf32> to vector<1x16x128xf32>
    %c0_11 = arith.constant 0 : index
    %c0_12 = arith.constant 0 : index
    %18 = vector.load %arg3[%c0_11, %c0_12] : memref<16x128xf32, #tpu.memory_space<vmem>>, vector<16x128xf32>
    %19 = vector.shape_cast %18 : vector<16x128xf32> to vector<1x16x128xf32>
    %20 = arith.addf %17, %19 : vector<1x16x128xf32>
    %c0_13 = arith.constant 0 : index
    %c0_14 = arith.constant 0 : index
    %c0_15 = arith.constant 0 : index
    %21 = vector.load %arg4[%c0_13, %c0_14, %c0_15] : memref<1x16x128xf32, #tpu.memory_space<vmem>>, vector<1x16x128xf32>
    tpu.vector_store %arg4[%c0_13, %c0_14, %c0_15], %20 {strides = array<i32>} : memref<1x16x128xf32, #tpu.memory_space<vmem>>, vector<1x16x128xf32>,
    return
  }
  func.func @transform_0(%arg0: i32) -> (i32, i32, i32) {
    %c0_i32 = arith.constant 0 : i32
    %c0_i32_0 = arith.constant 0 : i32
    %c0_i32_1 = arith.constant 0 : i32
    return %arg0, %c0_i32, %c0_i32_0 : i32, i32, i32
  }
  func.func @transform_1(%arg0: i32) -> (i32, i32, i32) {
    %c0_i32 = arith.constant 0 : i32
    %c0_i32_0 = arith.constant 0 : i32
    %c0_i32_1 = arith.constant 0 : i32
    %c0_i32_2 = arith.constant 0 : i32
    return %c0_i32, %c0_i32_0, %c0_i32_1 : i32, i32, i32
  }
  func.func @transform_2(%arg0: i32) -> (i32, i32) {
    %c0_i32 = arith.constant 0 : i32
    %c0_i32_0 = arith.constant 0 : i32
    %c0_i32_1 = arith.constant 0 : i32
    return %c0_i32, %c0_i32_0 : i32, i32
  }
  func.func @transform_3(%arg0: i32) -> (i32, i32, i32) {
    %c0_i32 = arith.constant 0 : i32
    %c0_i32_0 = arith.constant 0 : i32
    %c0_i32_1 = arith.constant 0 : i32
    return %arg0, %c0_i32, %c0_i32_0 : i32, i32, i32
  }
}

</mosaic_0001>

<bundles_post_ra>
// kernel: tpu_custom_call.1
= control target key start
LH: loop header
LB: loop body
LE: loop exit
PB: predicated region body
PF: predicated region fallthrough
CT: control target
= control target key end

     0   :  { %8 = vsyncpa [#allocation3], 0  ;;  %s818_s0 = inlined_call_operand.vmem [shape: f32[2,16,8], index: 0, kind: input, shape index: {}]   ;;  %s819_s1 = inlined_call_operand.vmem [shape: f32[3,8,128], index: 1, kind: input, shape index: {}]   ;;  %s820_s2 = inlined_call_operand.vmem [shape: f32[16,128], index: 2, kind: input, shape index: {}]   ;;  %s821_s3 = inlined_call_operand.hbm [shape: f32[2,16,128], index: 3, kind: output, shape index: {}]  }
   0x1   :  { %10 = vsyncpa [#allocation3 + $0x1], 0  ;;  %s694_s12 = smov 0   ;;  %s696_s13 = smov 0  }
   0x2   :  { %s698_s14 = smov 0   ;;  %s700_s15 = smov 0  }
   0x3 LB: > { %s715_s16 = sadd.s32 4294967295, %s669_s15   ;;  %s516_s17 = sadd.s32 4294967294, %s669_s15   ;;  %s669_s15 = sphi %s700_s15, %s827_s15   ;;  %s665_s14 = sphi %s698_s14, %s826_s14   ;;  %s661_s13 = sphi %s696_s13, %s825_s13   ;;  %s657_s12 = sphi %s694_s12, %s824_s12  }
   0x4   : > { %s719_s18 = sadd.s32 1, %s669_s15   ;;  %s91_s19 = sadd.s32 1, %s665_s14 }
   0x5   : > { %s88_s20 = ssub.s32 %s669_s15, %s719_s18  ;;  %p101_p0 = scmp.ne.s32.totalorder %s665_s14, %s661_s13 }
   0x6   : > { %p89_p1 = scmp.eq.s32.totalorder %s88_s20, 0  ;;  %p102_p2 = scmp.eq.s32.totalorder %s715_s16, 1 }
   0x7   : > { %p107_p3 = scmp.ne.s32.totalorder %s661_s13, %s657_s12  ;;  %p108_p4 = scmp.eq.s32.totalorder %s516_s17, 1 }
   0x8   : > { %s730_s21 = scalar_select %p89_p1, %s665_s14, %s91_s19  }
   0x9   : > { %p732_p5 = por %p102_p2, %p101_p0  ;;  %p736_p6 = por %p108_p4, %p107_p3 }
   0xa   : > { %p519_p7 = scmp.ge.s32.totalorder %s669_s15, 1  ;;  %p140_p8 = scmp.lt.s32.totalorder %s669_s15, 3 }
   0xc   : > { %p141_p9 = pnand %p519_p7, %p140_p8 }
   0xd   : > { %v183_v0 = vld [vmem:[%s819_s1] sm:$0xff] (!%p141_p9)  ;;  %p164_p10 = scmp.lt.s32.totalorder (!%p141_p9), %s715_s16, 1  ;;  %v173_v1 = vlaneseq (!%p141_p9)  ;;  %v528_v2 = vld [vmem:[%s819_s1 + $0x10] sm:$0xff] (!%p141_p9)  ;;  %v523_v3 = vld [vmem:[%s819_s1 + $0x8] sm:$0xff] (!%p141_p9)  ;;  %vm186_vm1 = vcmask (!%p141_p9), 64512   ;;  %s161_s8 = sand.u32 (!%p141_p9), 1, %s661_s13  }
   0xe   : > { %144 = sbr.rel (%p141_p9) target bundleno = 270 (0x10e), region = 32  ;;  %552 = vmatprep.subr.mxu0 (!%p141_p9), %v183_v0  ;;  %547 = vmatprep.subr.mxu1 (!%p141_p9), %v523_v3  ;;  %s520_s9 = sshll.u32 (!%p141_p9), %s161_s8, 4  ;;  %v435_v18 = vld [vmem:[%s820_s2 + $0x8] sm:$0xff] (!%p141_p9)  ;;  %v434_v21 = vld [vmem:[%s820_s2] sm:$0xff] (!%p141_p9) }
   0xf   : > { %553 = vmatpush3.msra.mxu0 (!%p141_p9), %v183_v0  ;;  %v174_v4 = vshrl.u32 (!%p141_p9), %v173_v1, 7  ;;  %548 = vmatpush3.msra.mxu1 (!%p141_p9), %v523_v3  ;;  %s163_s17 = scalar_lea.vmem (!%p141_p9), [#allocation2], %s520_s9  ;;  %s537_s20 = sshll.u32 (!%p141_p9), %s715_s16, 8 }
  0x10   : > { %557 = vmatprep.subr.mxu0 (!%p141_p9), %v528_v2  ;;  %s454_s19 = sshll.u32 (!%p141_p9), %s163_s17, 4  ;;  %s775_s28 = scalar_lea.hbm (!%p141_p9), %s821_s3, %s537_s20  ;;  %s770_s19 = int_to_ptr.vmem [resolvable:$true] %s454_s19 }
  0x11   : > { %vm175_vm0 = vcmp.lt.s32.totalorder (!%p141_p9), %v174_v4, 1  ;;  %vm180_vm2 = vcmp.lt.s32.totalorder (!%p141_p9), %v174_v4, 7  ;;  %s607_s29 = scalar_lea.vmem (!%p141_p9), %s770_s19, 256 }
  0x12   : > { %p608_p11 = scmp.ne.s32.totalorder (!%p141_p9), %s770_s19, %s607_s29 }
  0x14   : > { %p609_p12 = pnand (!%p141_p9), %p608_p11, %p732_p5 }
  0x15   : > { %s165_s30 = scalar_select %p164_p10, %s715_s16, 1 }
  0x16   : > { %s777_s16 = scalar_lea.sflag [#allocation3], %s161_s8  ;;  %p610_p13 = pneg %p609_p12 }
  0x17   : > { %s536_s4 = sshll.u32 %s165_s30, 4  ;;  %s671_s30 = smov [#allocation2]  }
  0x18   : > { %s168_s7 = scalar_lea.vmem %s818_s0, %s536_s4  ;;  %s611_s4 = sshll.u32 %s671_s30, 4  ;;  %s612_s4 = int_to_ptr.vmem [resolvable:$false] %s611_s4 }
  0x19   : > { %v169_v5 = vld [vmem:[%s168_s7] sm:$0xff]  ;;  %v170_v6 = vld [vmem:[%s168_s7 + $0x8] sm:$0xff]  ;;  %s613_s5 = scalar_lea.vmem %s612_s4, 512  ;;  %p614_p0 = scmp.lt.s32.totalorder %s770_s19, %s612_s4 }
  0x1a   : > { %v171_v7 = vrot.slane %v169_v5, 7  ;;  %v172_v8 = vrot.slane %v170_v6, 7  ;;  %549 = vmatprep.mubr.msk.f32.mxu1 %vm186_vm1, %v169_v5  ;;  %v178_v9 = vrot.slane %v169_v5, 1  ;;  %v179_v10 = vrot.slane %v170_v6, 1  ;;  %p615_p1 = scmp.lt.s32.totalorder %s613_s5, %s607_s29 }
  0x1b   : > { %550 = vmatmul.mubr.msk.f32.vlgmr.msra.gmra.mrb[0].mxu1 %vm186_vm1, %v170_v6 }
  0x1c   : > { %v177_v11 = vsel %vm175_vm0, %v172_v8, %v171_v7  ;;  %v176_v12 = vsel %vm175_vm0, %v171_v7, %v172_v8  ;;  %v181_v13 = vsel %vm180_vm2, %v178_v9, %v179_v10  ;;  %v182_v14 = vsel %vm180_vm2, %v179_v10, %v178_v9  ;;  %p616_p2 = por %p615_p1, %p614_p0 }
  0x1d   : > { %554 = vmatprep.mubr.msk.f32.mxu0 %vm186_vm1, %v177_v11 }
  0x1e   : > { %555 = vmatmul.mubr.msk.f32.vlgmr.msra.gmra.mrb[0].mxu0 %vm186_vm1, %v176_v12  ;;  %p617_p3 = pnand %p616_p2, %p610_p13 }
  0x1f   : > { %558 = vmatpush3.msra.mxu0 %v528_v2  ;;  %559 = vmatprep.mubr.msk.f32.mxu0 %vm186_vm1, %v181_v13 }
  0x26   : > { %560 = vmatmul.mubr.msk.f32.vlgmr.msra.gmra.mrb[0].mxu0 %vm186_vm1, %v182_v14 }
  0xee   : > { %v551_v15 = vpop.f32.mrb[0].mxu1 }
  0xef   : > { %v259_v16 = vpop.f32.mrb[1].mxu1 }
  0xf9   : > { %v561_v17 = vpop.f32.mrb[0].mxu0 }
  0xfa   : > { %v562_v19 = vadd.f32 %v561_v17, %v551_v15  ;;  %v423_v20 = vpop.f32.mrb[1].mxu0 }
  0xfb   : > { %v563_v22 = vadd.f32 %v423_v20, %v259_v16 }
  0xfc   : > { %v437_v23 = vadd.f32 %v562_v19, %v435_v18 }
  0xfd   : > { %v436_v24 = vadd.f32 %v563_v22, %v434_v21 }
  0xfe   : > { %439 = vst [vmem:[%s163_s17 + $0x8] sm:$0xff] %v437_v23 }
  0xff   : > { %438 = vst [vmem:[%s163_s17] sm:$0xff] %v436_v24 }
 0x100   : > { %620 = shalt.err (!%p617_p3)
}
 0x101   : > { %s621_s6 = scalar_lea.hbm %s775_s28, 256  ;;  %s625_s9 = scalar_lea.hbm %s821_s3, 512 }
 0x102   : > { %p622_p4 = scmp.ne.s32.totalorder %s775_s28, %s621_s6  ;;  %p626_p9 = scmp.lt.u32.totalorder %s775_s28, %s821_s3 }
 0x103   : > { %p627_p10 = scmp.lt.u32.totalorder %s625_s9, %s621_s6  ;;  %p629_p12 = scmp.lt.u32.totalorder %s621_s6, %s775_s28 }
 0x104   : > { %p623_p7 = pnand %p622_p4, %p732_p5 }
 0x105   : > { %p628_p11 = por %p627_p10, %p626_p9 }
 0x106   : > { %p624_p8 = pneg %p623_p7 }
 0x107   : > { %p630_p13 = por %p629_p12, %p628_p11 }
 0x109   : > { %p631_p0 = pnand %p630_p13, %p624_p8 }
 0x10b   : > { %634 = shalt.err (!%p631_p0)
}
 0x10c   : > { %s672_s17 = smov 128   ;;  %s673_s20 = smov 8  }
 0x10d   : > { %566 = dma.vmem_to_hbm [thread:$0]  (%p732_p5), %s770_s19, 256, %s775_s28, %s777_s16, %s672_s17, %s672_s17, %s673_s20  }
 0x10e PF: > { %p572_p1 = scmp.ge.s32.totalorder %s669_s15, 2  ;;  %s469_s24 = sand.u32 1, %s657_s12  }
 0x10f   : > { %s470_s25 = scalar_lea.sflag [#allocation3], %s469_s24 }
 0x110   : > { %p569_p2 = pnand %p572_p1, %p736_p6 }
 0x112   : > { %652 = dma.done.wait (!%p569_p2), %s470_s25, 256  }
 0x113   : > { %654 = vsyncadd (!%p569_p2), %s470_s25, 4294967040  ;;  %p13_p3 = scmp.ge.s32.totalorder %s719_s18, 4   ;;  %s824_s12 = smov %s661_s13 }
 0x114   : > { %s825_s13 = smov %s665_s14  ;;  %s826_s14 = smov %s730_s21 }
 0x115   : > { %s827_s15 = smov %s719_s18  ;;  %15 = sbr.rel (!%p13_p3) target bundleno = 3 (0x3), region = 69 }
 0x11c   :  { %475 = vsyncpa [#allocation3], 1 }
 0x11d   :  { %477 = vsyncpa [#allocation3 + $0x1], 1 }

</bundles_post_ra>
